<compile_context>
chip_gen: v7x
topology: tpu7x:2x2x1
jax: 0.10.0
libtpu: 0.0.40
codegen_flags: <defaults>
</compile_context>

<pallas_src>
import functools

import jax
import jax.numpy as jnp
from jax.experimental import pallas as pl
from jax.experimental.pallas import tpu as pltpu


def _round_up(x, m):
    return (x + m - 1) // m * m


def _cdiv(a, b):
    return (a + b - 1) // b


def prepare_table(table):
    """Pad the (V, C) embedding table to a lane-dense (V, Vp) f32 table ONCE.

    Padded columns hold -1e30 so in-kernel max / logsumexp ignore them."""
    V, C = table.shape
    Vp = _round_up(C, 128)
    t = table.astype(jnp.float32)
    if Vp != C:
        t = jnp.pad(t, ((0, 0), (0, Vp - C)), constant_values=-1e30)
    return t


def _loss_block(logits, tgt, nll_ref, tile_bt, bt_valid):
    """f32 cross-entropy for one tile, reduced to a single per-tile sum."""
    vp = logits.shape[-1]
    col = jax.lax.broadcasted_iota(jnp.int32, (tile_bt, vp), 1)
    m = jnp.max(logits, axis=-1, keepdims=True)
    lse = m + jnp.log(jnp.sum(jnp.exp(logits - m), axis=-1, keepdims=True))
    tgt_logit = jnp.sum(jnp.where(col == tgt, logits, 0.0),
                        axis=-1, keepdims=True)
    nll = lse - tgt_logit                                   # (tile_bt, 1)
    # Mask out padded rows (only the last tile can have them); BT is static.
    rows = (pl.program_id(0) * tile_bt
            + jax.lax.broadcasted_iota(jnp.int32, (tile_bt, 1), 0))
    nll = jnp.where(rows < bt_valid, nll, 0.0)
    tile_sum = jnp.sum(nll)
    nll_ref[...] = jnp.broadcast_to(tile_sum, nll_ref.shape).astype(nll_ref.dtype)


def _bigram_vmem_kernel(*refs, tile_bt, bt_valid, compute_loss):
    """VMEM-resident table path: gather = one-hot select on the (otherwise idle) MXU."""
    if compute_loss:
        idx_ref, tgt_ref, table_ref, logits_ref, nll_ref = refs
    else:
        idx_ref, table_ref, logits_ref = refs

    toks = idx_ref[...]                                     # (tile_bt, 1) int32
    tbl = table_ref[...]                                    # (V, Vp) f32, resident
    v = tbl.shape[0]

    onehot = (jax.lax.broadcasted_iota(jnp.int32, (tile_bt, v), 1)
              == toks).astype(jnp.float32)                  # (tile_bt, V)
    logits = jnp.dot(onehot, tbl, preferred_element_type=jnp.float32)
    logits_ref[...] = logits                                # lane-dense store

    if compute_loss:
        _loss_block(logits, tgt_ref[...], nll_ref, tile_bt, bt_valid)


def _bigram_hbm_kernel(idx_sref, *refs, tile_bt, bt_valid, compute_loss):
    """Fallback for tables too large for VMEM: per-row DMA gather from HBM,
    directly into the logits output block (no intermediate scratch)."""
    if compute_loss:
        tgt_ref, table_hbm, logits_ref, nll_ref, sems = refs
    else:
        table_hbm, logits_ref, sems = refs

    base = pl.program_id(0) * tile_bt
    copies = []
    for r in range(tile_bt):                                # tile_bt kept small here
        tok = idx_sref[base + r]
        c = pltpu.make_async_copy(table_hbm.at[pl.ds(tok, 1), :],
                                  logits_ref.at[pl.ds(r, 1), :],
                                  sems.at[r])
        c.start()
        copies.append(c)
    for c in copies:
        c.wait()

    if compute_loss:
        _loss_block(logits_ref[...], tgt_ref[...], nll_ref, tile_bt, bt_valid)


def bigram_forward(index_TB, table, targets_BT=None, *, table_padded=None,
                   force_hbm_table=False):
    """index_TB: (T, B) integer tokens (the PyTorch model transposes internally).
    table: (V, V) float32 nn.Embedding weight.
    targets_BT: optional (B, T) integer targets.
    table_padded: optional pre-padded table from prepare_table() (hoists the pad
    out of the per-call path).
    Returns (logits (B, T, V) float32, loss)."""
    index_BT = jnp.transpose(index_TB, (1, 0))              # matches .transpose(0, 1)
    B, T = index_BT.shape
    V, C = table.shape                                      # C == V for this model
    BT = B * T

    table_p = prepare_table(table) if table_padded is None else table_padded
    Vp = table_p.shape[1]

    # ---- per-generation VMEM budget (v5e/v6e: 128 MiB phys, v7x: 64 MiB) ----
    try:
        vmem_cap = int(pltpu.get_tpu_info().vmem_capacity_bytes)
    except Exception:
        vmem_cap = 64 * 1024 * 1024
    vmem_budget = min(vmem_cap // 2, 64 * 1024 * 1024)

    table_bytes = V * Vp * 4
    table_in_vmem = (not force_hbm_table) and (2 * table_bytes <= vmem_budget // 2)

    # ---- Vp-aware tile size on the flattened (B*T) axis ----------------------
    if table_in_vmem:
        avail = max(vmem_budget - 2 * table_bytes - (1 << 16), 8 * (4 * Vp + V) * 4)
        per_row = (4 * Vp + V) * 4          # 2x logits bufs + in-kernel values
        tile_bt = max(8, min(512, (avail // per_row) // 8 * 8))
    else:
        avail = max(vmem_budget - (1 << 16), 8 * 3 * Vp * 4)
        per_row = 3 * Vp * 4                # 2x logits bufs + headroom
        tile_bt = max(8, min(32, (avail // per_row) // 8 * 8))
    tile_bt = min(tile_bt, _round_up(BT, 8))
    if _round_up(BT, 8) > 8:                # v7x: >= 2 tiles so both TCs get work
        tile_bt = max(8, min(tile_bt, _round_up(_cdiv(BT, 2), 8)))

    bt_pad = _round_up(BT, tile_bt)
    num_tiles = bt_pad // tile_bt

    idx_flat = jnp.clip(index_BT.reshape(BT).astype(jnp.int32), 0, V - 1)
    idx_pad = jnp.pad(idx_flat, (0, bt_pad - BT))           # padded rows gather row 0
    idx_col = idx_pad.reshape(bt_pad, 1)

    compute_loss = targets_BT is not None
    if compute_loss:
        tgt_flat = jnp.clip(targets_BT.reshape(BT).astype(jnp.int32), 0, C - 1)
        tgt_pad = jnp.pad(tgt_flat, (0, bt_pad - BT)).reshape(bt_pad, 1)

    compiler_params = pltpu.CompilerParams(
        dimension_semantics=("parallel",),                  # shards tiles over TCs (v7x)
        vmem_limit_bytes=int(vmem_budget),
    )

    logits_shape = jax.ShapeDtypeStruct((bt_pad, Vp), jnp.float32)
    logits_spec = pl.BlockSpec((tile_bt, Vp), lambda i, *_: (i, 0))
    if compute_loss:
        out_shape = (logits_shape,
                     jax.ShapeDtypeStruct((num_tiles * 8, 128), jnp.float32))
        out_specs = [logits_spec, pl.BlockSpec((8, 128), lambda i, *_: (i, 0))]
    else:
        out_shape = logits_shape
        out_specs = logits_spec

    if table_in_vmem:
        kern = functools.partial(_bigram_vmem_kernel, tile_bt=tile_bt,
                                 bt_valid=BT, compute_loss=compute_loss)
        in_specs = [pl.BlockSpec((tile_bt, 1), lambda i, *_: (i, 0))]   # token ids
        args = [idx_col]
        if compute_loss:
            in_specs.append(pl.BlockSpec((tile_bt, 1), lambda i, *_: (i, 0)))
            args.append(tgt_pad)
        in_specs.append(pl.BlockSpec((V, Vp), lambda i, *_: (0, 0)))    # resident table
        args.append(table_p)
        grid_spec = pltpu.PrefetchScalarGridSpec(
            num_scalar_prefetch=0, grid=(num_tiles,),
            in_specs=in_specs, out_specs=out_specs)
        outs = pl.pallas_call(kern, out_shape=out_shape, grid_spec=grid_spec,
                              compiler_params=compiler_params)(*args)
    else:
        kern = functools.partial(_bigram_hbm_kernel, tile_bt=tile_bt,
                                 bt_valid=BT, compute_loss=compute_loss)
        in_specs = []
        args = [idx_pad]                                     # scalar-prefetched to SMEM
        if compute_loss:
            in_specs.append(pl.BlockSpec((tile_bt, 1), lambda i, *_: (i, 0)))
            args.append(tgt_pad)
        in_specs.append(pl.BlockSpec(memory_space=pl.ANY))   # table stays in HBM
        args.append(table_p)
        grid_spec = pltpu.PrefetchScalarGridSpec(
            num_scalar_prefetch=1, grid=(num_tiles,),
            in_specs=in_specs, out_specs=out_specs,
            scratch_shapes=[pltpu.SemaphoreType.DMA((tile_bt,))])
        outs = pl.pallas_call(kern, out_shape=out_shape, grid_spec=grid_spec,
                              compiler_params=compiler_params)(*args)

    if compute_loss:
        logits_p, nll = outs
        loss = jnp.sum(nll[::8, 0]) / BT / T                 # mean CE over B*T, then /T
    else:
        logits_p = outs
        loss = jnp.zeros((1,), dtype=jnp.float32) / T        # tensor(0.).unsqueeze(0)/T

    logits = logits_p[:BT, :C].reshape(B, T, C)
    return logits, loss


if __name__ == "__main__":
    # Small, deterministic problem: vocab=128, B=2, T=8.
    V = 128
    B, T = 2, 8

    key = jax.random.PRNGKey(0)
    k_tab, k_idx, k_tgt = jax.random.split(key, 3)

    # nn.Embedding(vocab, vocab) weight ~ N(0, 1)
    table = jax.random.normal(k_tab, (V, V), dtype=jnp.float32)
    table_p = prepare_table(table)                           # hoisted pad (init-time)

    # PyTorch call passes index of shape (T, B) (it transposes internally).
    index_TB = jax.random.randint(k_idx, (T, B), 0, V, dtype=jnp.int32)
    targets_BT = jax.random.randint(k_tgt, (B, T), 0, V, dtype=jnp.int32)

    # Plain-JAX reference (embedding gather + mean cross-entropy / T).
    idx_BT = jnp.transpose(index_TB, (1, 0))
    ref_logits = table[idx_BT]                               # (B, T, V)
    lf = ref_logits.reshape(B * T, V)
    tf = targets_BT.reshape(B * T)
    lse = jax.scipy.special.logsumexp(lf, axis=-1)
    ref_loss = jnp.mean(lse - lf[jnp.arange(B * T), tf]) / T

    # 1) Main path: VMEM-resident table (the common small-vocab case).
    logits, loss = bigram_forward(index_TB, table, targets_BT, table_padded=table_p)
    logits = jax.block_until_ready(logits)
    loss = jax.block_until_ready(loss)
    assert logits.shape == (B, T, V)
    assert jnp.allclose(logits, ref_logits, atol=1e-5), "logits mismatch"
    assert jnp.allclose(loss, ref_loss, atol=1e-5, rtol=1e-5), "loss mismatch"

    # 2) Inference path: cross-entropy compiled out, loss = zeros(1) / T.
    logits2, loss2 = bigram_forward(index_TB, table, None, table_padded=table_p)
    logits2 = jax.block_until_ready(logits2)
    loss2 = jax.block_until_ready(loss2)
    assert jnp.allclose(logits2, ref_logits, atol=1e-5), "no-target logits mismatch"
    assert loss2.shape == (1,) and float(loss2[0]) == 0.0

    # 3) Large-vocab fallback (table kept in HBM, DMA row gather) forced on the
    #    same small problem to validate it end to end.
    logits3, loss3 = bigram_forward(index_TB, table, targets_BT,
                                    table_padded=table_p, force_hbm_table=True)
    logits3 = jax.block_until_ready(logits3)
    loss3 = jax.block_until_ready(loss3)
    assert jnp.allclose(logits3, ref_logits, atol=1e-5), "HBM-path logits mismatch"
    assert jnp.allclose(loss3, ref_loss, atol=1e-5, rtol=1e-5), "HBM-path loss mismatch"

    # TODO(synk): generate() (multinomial sampling loop) is host-side control
    # flow around forward(); not implemented as a kernel.
    print("KERNEL_OK")
</pallas_src>

<mosaic_0001>
module attributes {stable_mosaic.version = 11 : i64} {
  func.func @_bigram_vmem_kernel(%arg0: i32, %arg1: memref<8x1xi32, #tpu.memory_space<vmem>>, %arg2: memref<8x1xi32, #tpu.memory_space<vmem>>, %arg3: memref<128x128xf32, #tpu.memory_space<vmem>>, %arg4: memref<8x128xf32, #tpu.memory_space<vmem>>, %arg5: memref<8x128xf32, #tpu.memory_space<vmem>>) attributes {dimension_semantics = [#tpu.dimension_semantics<parallel>], iteration_bounds = array<i64: 2>, scalar_prefetch = 0 : i64, scratch_operands = 0 : i64, tpu.core_type = #tpu.core_type<tc>, window_params = [{transform_indices = @transform_0, window_bounds = array<i64: 8, 1>}, {transform_indices = @transform_1, window_bounds = array<i64: 8, 1>}, {pipeline_mode = #tpu.pipeline_mode<synchronous>, transform_indices = @transform_2, window_bounds = array<i64: 128, 128>}, {transform_indices = @transform_3, window_bounds = array<i64: 8, 128>}, {transform_indices = @transform_4, window_bounds = array<i64: 8, 128>}]} {
    %c0 = arith.constant 0 : index
    %c0_0 = arith.constant 0 : index
    %0 = vector.load %arg1[%c0, %c0_0] : memref<8x1xi32, #tpu.memory_space<vmem>>, vector<8x1xi32>
    %c0_1 = arith.constant 0 : index
    %c0_2 = arith.constant 0 : index
    %1 = vector.load %arg3[%c0_1, %c0_2] : memref<128x128xf32, #tpu.memory_space<vmem>>, vector<128x128xf32>
    %2 = tpu.iota {dimensions = array<i32: 1>} : vector<8x128xi32>
    %3 = vector.broadcast %0 : vector<8x1xi32> to vector<8x128xi32>
    %4 = arith.cmpi eq, %2, %3 : vector<8x128xi32>
    %5 = arith.extui %4 : vector<8x128xi1> to vector<8x128xi32>
    %6 = arith.sitofp %5 : vector<8x128xi32> to vector<8x128xf32>
    %cst = arith.constant dense<0.000000e+00> : vector<8x128xf32>
    %7 = tpu.matmul %6, %1, %cst {dimension_numbers = #tpu.dot_dimension_numbers<[1], [0], [0], [1], [0, 0, 1, 1], [], []>} : vector<8x128xf32>, vector<128x128xf32>, vector<8x128xf32> -> vector<8x128xf32>
    %c0_3 = arith.constant 0 : index
    %c0_4 = arith.constant 0 : index
    %8 = vector.load %arg4[%c0_3, %c0_4] : memref<8x128xf32, #tpu.memory_space<vmem>>, vector<8x128xf32>
    tpu.vector_store %arg4[%c0_3, %c0_4], %7 {strides = array<i32>} : memref<8x128xf32, #tpu.memory_space<vmem>>, vector<8x128xf32>,
    %c0_5 = arith.constant 0 : index
    %c0_6 = arith.constant 0 : index
    %9 = vector.load %arg2[%c0_5, %c0_6] : memref<8x1xi32, #tpu.memory_space<vmem>>, vector<8x1xi32>
    %10 = tpu.iota {dimensions = array<i32: 1>} : vector<8x128xi32>
    %cst_7 = arith.constant dense<0xFF800000> : vector<8xf32>
    %11 = vector.multi_reduction <maximumf>, %7, %cst_7 [1] : vector<8x128xf32> to vector<8xf32>
    %12 = vector.shape_cast %11 : vector<8xf32> to vector<8x1xf32>
    %13 = vector.broadcast %12 : vector<8x1xf32> to vector<8x128xf32>
    %14 = arith.subf %7, %13 : vector<8x128xf32>
    %15 = math.exp %14 : vector<8x128xf32>
    %cst_8 = arith.constant dense<0.000000e+00> : vector<8xf32>
    %16 = vector.multi_reduction <add>, %15, %cst_8 [1] : vector<8x128xf32> to vector<8xf32>
    %17 = vector.shape_cast %16 : vector<8xf32> to vector<8x1xf32>
    %18 = math.log %17 : vector<8x1xf32>
    %19 = arith.addf %12, %18 : vector<8x1xf32>
    %20 = vector.broadcast %9 : vector<8x1xi32> to vector<8x128xi32>
    %21 = arith.cmpi eq, %10, %20 : vector<8x128xi32>
    %cst_9 = arith.constant 0.000000e+00 : f32
    %22 = vector.broadcast %cst_9 : f32 to vector<8x128xf32>
    %23 = arith.select %21, %7, %22 : vector<8x128xi1>, vector<8x128xf32>
    %cst_10 = arith.constant dense<0.000000e+00> : vector<8xf32>
    %24 = vector.multi_reduction <add>, %23, %cst_10 [1] : vector<8x128xf32> to vector<8xf32>
    %25 = vector.shape_cast %24 : vector<8xf32> to vector<8x1xf32>
    %26 = arith.subf %19, %25 : vector<8x1xf32>
    %c8_i32 = arith.constant 8 : i32
    %27 = arith.muli %arg0, %c8_i32 : i32
    %28 = tpu.iota {dimensions = array<i32: 0>} : vector<8x1xi32>
    %29 = vector.broadcast %27 : i32 to vector<8x1xi32>
    %30 = arith.addi %29, %28 : vector<8x1xi32>
    %c16_i32 = arith.constant 16 : i32
    %31 = vector.broadcast %c16_i32 : i32 to vector<8x1xi32>
    %32 = arith.cmpi slt, %30, %31 : vector<8x1xi32>
    %cst_11 = arith.constant 0.000000e+00 : f32
    %33 = vector.broadcast %cst_11 : f32 to vector<8x1xf32>
    %34 = arith.select %32, %26, %33 : vector<8x1xi1>, vector<8x1xf32>
    %35 = vector.shape_cast %34 : vector<8x1xf32> to vector<1x8x1xf32>
    %cst_12 = arith.constant dense<0.000000e+00> : vector<1xf32>
    %36 = vector.multi_reduction <add>, %35, %cst_12 [1, 2] : vector<1x8x1xf32> to vector<1xf32>
    %37 = vector.shape_cast %36 : vector<1xf32> to vector<1x1x1xf32>
    %38 = vector.extract %37[0, 0, 0] : f32 from vector<1x1x1xf32>
    %39 = vector.broadcast %38 : f32 to vector<8x128xf32>
    %c0_13 = arith.constant 0 : index
    %c0_14 = arith.constant 0 : index
    %40 = vector.load %arg5[%c0_13, %c0_14] : memref<8x128xf32, #tpu.memory_space<vmem>>, vector<8x128xf32>
    tpu.vector_store %arg5[%c0_13, %c0_14], %39 {strides = array<i32>} : memref<8x128xf32, #tpu.memory_space<vmem>>, vector<8x128xf32>,
    return
  }
  func.func @transform_0(%arg0: i32) -> (i32, i32) {
    %c0_i32 = arith.constant 0 : i32
    %c0_i32_0 = arith.constant 0 : i32
    return %arg0, %c0_i32 : i32, i32
  }
  func.func @transform_1(%arg0: i32) -> (i32, i32) {
    %c0_i32 = arith.constant 0 : i32
    %c0_i32_0 = arith.constant 0 : i32
    return %arg0, %c0_i32 : i32, i32
  }
  func.func @transform_2(%arg0: i32) -> (i32, i32) {
    %c0_i32 = arith.constant 0 : i32
    %c0_i32_0 = arith.constant 0 : i32
    %c0_i32_1 = arith.constant 0 : i32
    return %c0_i32, %c0_i32_0 : i32, i32
  }
  func.func @transform_3(%arg0: i32) -> (i32, i32) {
    %c0_i32 = arith.constant 0 : i32
    %c0_i32_0 = arith.constant 0 : i32
    return %arg0, %c0_i32 : i32, i32
  }
  func.func @transform_4(%arg0: i32) -> (i32, i32) {
    %c0_i32 = arith.constant 0 : i32
    %c0_i32_0 = arith.constant 0 : i32
    return %arg0, %c0_i32 : i32, i32
  }
}

</mosaic_0001>

<bundles_post_ra>
// kernel: tpu_custom_call.1
= control target key start
LH: loop header
LB: loop body
LE: loop exit
PB: predicated region body
PF: predicated region fallthrough
CT: control target
= control target key end

     0   :  { %10 = vsyncpa [#allocation3], 0  ;;  %s1020_s0 = inlined_call_operand.vmem [shape: s32[16,1], index: 0, kind: input, shape index: {}]   ;;  %s1021_s1 = inlined_call_operand.vmem [shape: s32[16,1], index: 1, kind: input, shape index: {}]   ;;  %s1022_s2 = inlined_call_operand.hbm [shape: f32[128,128], index: 2, kind: input, shape index: {}]   ;;  %s1023_s3 = inlined_call_operand.hbm [shape: f32[16,128], index: 3, kind: output, shape index: {0}]   ;;  %s1024_s4 = inlined_call_operand.hbm [shape: f32[16,128], index: 4, kind: output, shape index: {1}]  }
   0x1   :  { %11 = vsyncpa [#allocation4], 0 }
   0x2   :  { %13 = vsyncpa [#allocation4 + $0x1], 0 }
   0x3   :  { %14 = vsyncpa [#allocation7], 0 }
   0x4   :  { %16 = vsyncpa [#allocation7 + $0x1], 0  ;;  %s846_s15 = smov 0   ;;  %s848_s16 = smov 0  }
   0x5   :  { %s850_s17 = smov 0   ;;  %s852_s18 = smov 0  }
   0x6 LB: > { %s867_s19 = sadd.s32 4294967295, %s809_s18   ;;  %s518_s20 = sadd.s32 4294967294, %s809_s18   ;;  %s809_s18 = sphi %s852_s18, %s1040_s18   ;;  %s805_s17 = sphi %s850_s17, %s1039_s17   ;;  %s801_s16 = sphi %s848_s16, %s1038_s16   ;;  %s797_s15 = sphi %s846_s15, %s1037_s15  }
   0x7   : > { %s871_s21 = sadd.s32 1, %s809_s18   ;;  %s102_s22 = sadd.s32 1, %s805_s17 }
   0x8   : > { %s99_s23 = ssub.s32 %s809_s18, %s871_s21  ;;  %p112_p0 = scmp.ne.s32.totalorder %s805_s17, %s801_s16 }
   0x9   : > { %p100_p1 = scmp.eq.s32.totalorder %s99_s23, 0  ;;  %p113_p2 = scmp.eq.s32.totalorder %s867_s19, 1 }
   0xa   : > { %p118_p3 = scmp.ne.s32.totalorder %s801_s16, %s797_s15  ;;  %p119_p4 = scmp.eq.s32.totalorder %s518_s20, 1 }
   0xb   : > { %s882_s24 = scalar_select %p100_p1, %s805_s17, %s102_s22  }
   0xc   : > { %p884_p5 = por %p113_p2, %p112_p0  ;;  %p888_p6 = por %p119_p4, %p118_p3 }
   0xd   : > { %p519_p7 = scmp.ge.s32.totalorder %s809_s18, 1  ;;  %p152_p8 = scmp.lt.s32.totalorder %s809_s18, 3 }
   0xe   : > { %s1028_s25 = scalar_select %p884_p5, 1, 0 }
   0xf   : > { %s1029_s26 = scalar_select %p888_p6, 1, 0 }
  0x10   : > { %p1025_p9 = scmp.eq.s32.totalorder %s867_s19, 0  ;;  %p895_p10 = pnand %p519_p7, %p152_p8 }
  0x11   : > { %s811_s28 = smov [#allocation2]   ;;  %s683_s7 = scalar_lea.hbm %s1022_s2, 2048 }
  0x12   : > { %s1030_s27 = scalar_select %p895_p10, 1, 0 }
  0x13   : > { %s164_s29 = sshll.u32 %s811_s28, 4  ;;  %p623_p11 = pneg %p895_p10  ;;  %s165_s29 = int_to_ptr.vmem [resolvable:$true] %s164_s29 }
  0x14   : > { %p684_p13 = scmp.ne.s32.totalorder %s1022_s2, %s683_s7  ;;  %p690_p3 = scmp.lt.u32.totalorder %s683_s7, %s1022_s2 }
  0x15   : > { %p903_p12 = pnand %p1025_p9, %p623_p11 }
  0x17   : > { %p685_p0 = pneg %p903_p12 }
  0x19   : > { %p686_p1 = pnand %p685_p0, %p684_p13 }
  0x1b   : > { %p687_p2 = pneg %p686_p1 }
  0x1d   : > { %p692_p4 = pnand %p690_p3, %p687_p2 }
  0x1f   : > { %695 = shalt.err (!%p692_p4)
}
  0x20   : > { %s696_s12 = scalar_lea.vmem %s165_s29, 2048  ;;  %p704_p9 = scmp.lt.s32.totalorder %s165_s29, %s165_s29 }
  0x21   : > { %p697_p7 = scmp.ne.s32.totalorder %s165_s29, %s696_s12  ;;  %p705_p6 = scmp.lt.s32.totalorder %s696_s12, %s696_s12 }
  0x23   : > { %p699_p8 = pnand %p697_p7, %p685_p0  ;;  %p706_p5 = por %p705_p6, %p704_p9 }
  0x25   : > { %p700_p11 = pneg %p699_p8 }
  0x27   : > { %p707_p10 = pnand %p706_p5, %p700_p11 }
  0x29   : > { %710 = shalt.err (!%p707_p10)
}
  0x2a   : > { %s812_s13 = smov 128   ;;  %s813_s14 = smov 8  }
  0x2b   : > { %626 = dma.hbm_to_vmem [thread:$0]  (!%p903_p12), %s1022_s2, 2048, %s165_s29, [#allocation3], %s812_s13, %s812_s13, %s813_s14  }
  0x2c   : > { %p1032_p13 = scmp.ne.s32.totalorder %s1030_s27, 0 }
  0x2d   : > { %p1033_p1 = scmp.eq.s32.totalorder (!%p1032_p13), %s867_s19, 0 }
  0x2e   : > { %194 = sbr.rel (%p1032_p13) target bundleno = 939 (0x3ab), region = 32 }
  0x35   : > { %784 = dma.done.wait (%p1033_p1), [#allocation3], 2048   ;;  %p1034_p0 = pmov %p1033_p1 }
  0x36   : > { %p228_p5 = scmp.lt.s32.totalorder %s867_s19, 1  ;;  %v814_v0 = vmov 0   ;;  %v815_v1 = vmov 0.0|0.0   ;;  %v237_v3 = vld [vmem:[#allocation2] sm:$0xff]  ;;  %v238_v4 = vld [vmem:[#allocation2 + $0x8] sm:$0xff]  ;;  %v239_v6 = vld [vmem:[#allocation2 + $0x10] sm:$0xff]  ;;  %v253_v29 = vlaneseq }
  0x37   : > { %786 = vsyncadd (%p1034_p0), [#allocation3], 4294965248  ;;  %677 = vset.pattern.permute.xlu0 %v814_v0  ;;  %589 = vmatprep.subr.bf16.mxu0 %v815_v1  ;;  %v590_v5 = vpack.c.bf16 %v238_v4, %v237_v3  ;;  %v240_v7 = vld [vmem:[#allocation2 + $0x18] sm:$0xff]  ;;  %vm816_vm0 = vmmov 0   ;;  %v817_v8 = vmov 0.0   ;;  %v241_v10 = vld [vmem:[#allocation2 + $0x20] sm:$0xff] }
  0x38   : > { %s229_s23 = scalar_select %p228_p5, %s867_s19, 1  ;;  %678 = vset.pattern.permute.xlu1 %v814_v0  ;;  %586 = vmatprep.mubr.msk.f32.mxu0 %vm816_vm0, %v817_v8  ;;  %v593_v9 = vpack.c.bf16 %v240_v7, %v239_v6  ;;  %v242_v11 = vld [vmem:[#allocation2 + $0x28] sm:$0xff]  ;;  %v243_v14 = vld [vmem:[#allocation2 + $0x30] sm:$0xff]  ;;  %v244_v15 = vld [vmem:[#allocation2 + $0x38] sm:$0xff]  ;;  %v254_v30 = vand.u32 127, %v253_v29  ;;  %v818_v32 = vmov 1.0  }
  0x39   : > { %591 = vmatpush3.bf16.msra.mxu0 %v590_v5  ;;  %v596_v13 = vpack.c.bf16 %v242_v11, %v241_v10  ;;  %v599_v16 = vpack.c.bf16 %v244_v15, %v243_v14  ;;  %v245_v17 = vld [vmem:[#allocation2 + $0x40] sm:$0xff]  ;;  %v246_v18 = vld [vmem:[#allocation2 + $0x48] sm:$0xff]  ;;  %v247_v20 = vld [vmem:[#allocation2 + $0x50] sm:$0xff]  ;;  %s938_s8 = sand.u32 1, %s801_s16   ;;  %s530_s11 = sshll.u32 %s867_s19, 3  ;;  %v353_v42 = vshrl.u32 %v253_v29, 7 }
  0x3a   : > { %s526_s28 = sshll.u32 %s229_s23, 3  ;;  %592 = vmatprep.subr.bf16.mxu0 %v815_v1  ;;  %v602_v19 = vpack.c.bf16 %v246_v18, %v245_v17  ;;  %v248_v21 = vld [vmem:[#allocation2 + $0x58] sm:$0xff]  ;;  %v249_v23 = vld [vmem:[#allocation2 + $0x60] sm:$0xff]  ;;  %v250_v24 = vld [vmem:[#allocation2 + $0x68] sm:$0xff]  ;;  %s524_s9 = sshll.u32 %s938_s8, 3  ;;  %v354_v43 = vstv %s530_s11  ;;  %vm358_vm4 = vcmask 7168  }
  0x3b   : > { %s231_s27 = scalar_lea.vmem %s1020_s0, %s526_s28  ;;  %s235_s7 = scalar_lea.vmem %s1021_s1, %s526_s28  ;;  %v605_v22 = vpack.c.bf16 %v248_v21, %v247_v20  ;;  %v608_v25 = vpack.c.bf16 %v250_v24, %v249_v23  ;;  %v251_v26 = vld [vmem:[#allocation2 + $0x70] sm:$0xff]  ;;  %v252_v27 = vld [vmem:[#allocation2 + $0x78] sm:$0xff]  ;;  %v355_v45 = vadd.s32 %v354_v43, %v353_v42 }
  0x3c   : > { %v236_v2 = vld [vmem:[%s231_s27] sm:$0xff]  ;;  %v611_v28 = vpack.c.bf16 %v252_v27, %v251_v26  ;;  %s220_s10 = scalar_lea.vmem [#allocation5], %s524_s9  ;;  %s533_s12 = sshll.u32 %s867_s19, 7 }
  0x3d   : > { %256 = vperm.xlu0 %677, %v236_v2   ;;  %v332_v12 = vld [vmem:[%s235_s7] sm:$0xff]  ;;  %594 = vmatpush3.bf16.msra.mxu0 %v593_v9  ;;  %vm356_vm3 = vcmp.lt.s32.totalorder %v355_v45, 16  ;;  %s950_s20 = scalar_lea.hbm %s1023_s3, %s533_s12  ;;  %s390_s22 = sshll.u32 %s220_s10, 4  ;;  %s391_s22 = int_to_ptr.vmem [resolvable:$true] %s390_s22 }
  0x3e   : > { %344 = vperm.xlu1 %678, %v332_v12   ;;  %595 = vmatprep.subr.bf16.mxu0 %v815_v1  ;;  %s372_s23 = scalar_lea.sflag [#allocation4], %s938_s8  ;;  %s711_s28 = scalar_lea.vmem %s391_s22, 128 }
  0x3f   : > { %p712_p6 = scmp.ne.s32.totalorder %s391_s22, %s711_s28  ;;  %p1035_p9 = scmp.ne.s32.totalorder %s1028_s25, 0 }
  0x40   : > { %s819_s29 = smov [#allocation5]  }
  0x41   : > { %597 = vmatpush3.bf16.msra.mxu0 %v596_v13  ;;  %p713_p10 = pnand %p712_p6, %p1035_p9  ;;  %s715_s30 = sshll.u32 %s819_s29, 4  ;;  %s716_s30 = int_to_ptr.vmem [resolvable:$false] %s715_s30 }
  0x42   : > { %598 = vmatprep.subr.bf16.mxu0 %v815_v1  ;;  %s717_s27 = scalar_lea.vmem %s716_s30, 256  ;;  %p718_p2 = scmp.lt.s32.totalorder %s391_s22, %s716_s30 }
  0x43   : > { %p714_p12 = pneg %p713_p10  ;;  %p719_p3 = scmp.lt.s32.totalorder %s717_s27, %s711_s28 }
  0x45   : > { %600 = vmatpush3.bf16.msra.mxu0 %v599_v16  ;;  %p720_p4 = por %p719_p3, %p718_p2 }
  0x46   : > { %601 = vmatprep.subr.bf16.mxu0 %v815_v1 }
  0x47   : > { %p721_p7 = pnand %p720_p4, %p714_p12 }
  0x49   : > { %603 = vmatpush3.bf16.msra.mxu0 %v602_v19 }
  0x4a   : > { %604 = vmatprep.subr.bf16.mxu0 %v815_v1 }
  0x4d   : > { %606 = vmatpush3.bf16.msra.mxu0 %v605_v22 }
  0x4e   : > { %607 = vmatprep.subr.bf16.mxu0 %v815_v1 }
  0x51   : > { %609 = vmatpush3.bf16.msra.mxu0 %v608_v25 }
  0x52   : > { %610 = vmatprep.subr.bf16.mxu0 %v815_v1 }
  0x55   : > { %612 = vmatpush3.bf16.msra.mxu0 %v611_v28 }
  0xbc   : > { %v257_v31 = vpop.permute.xlu0 %256 }
  0xbd   : > { %vm258_vm1 = vcmp.eq.s32.totalorder %v254_v30, %v257_v31  ;;  %v345_v33 = vpop.permute.xlu1 %344 }
  0xbe   : > { %587 = vmatmul.mubr.msk.f32.vlgmr.msra.gmra.mrb[0].mxu0 %vm258_vm1, %v818_v32  ;;  %vm346_vm2 = vcmp.eq.s32.totalorder %v254_v30, %v345_v33 }
 0x191   : > { %v327_v34 = vpop.f32.mrb[0].mxu0 }
 0x192   : > { %333 = vmax.xlane.f32.xlu0 %v327_v34  ;;  %v588_v35 = vpop.f32.mrb[1].mxu0  ;;  %v347_v36 = vsel %vm346_vm2, %v327_v34, 0.0  ;;  %331 = vst [vmem:[%s220_s10] sm:$0xff] %v327_v34 }
 0x196   : > { %348 = vadd.xlane.f32.xlu0 %v347_v36 }
 0x21f   : > { %v334_v37 = vpop.xlane.xlu0 %333 }
 0x220   : > { %v335_v38 = vsub.f32 %v327_v34, %v334_v37 }
 0x222   : > { %v336_v39 = vmul.f32 1.442695, %v335_v38 }
 0x223   : > { %v349_v48 = vpop.xlane.xlu0 %348 }
 0x224   : > { %679 = vpow2.f32 %v336_v39 }
 0x22e   : > { %v680_v40 = vpop.eup %679 }
 0x22f   : > { %338 = vadd.xlane.f32.xlu1 %v680_v40 }
 0x2bc   : > { %v339_v41 = vpop.xlane.xlu1 %338 }
 0x2bd   : > { %681 = vlog2.f32 %v339_v41 }
 0x2c7   : > { %v682_v44 = vpop.eup %681 }
 0x2c8   : > { %v341_v46 = vmul.f32 0.6931472, %v682_v44 }
 0x2ca   : > { %v342_v47 = vadd.f32 %v341_v46, %v334_v37 }
 0x2cc   : > { %v350_v49 = vsub.f32 %v342_v47, %v349_v48 }
 0x2ce   : > { %v357_v50 = vsel %vm356_vm3, %v350_v49, 0.0 }
 0x2cf   : > { %v359_v51 = vsel %vm358_vm4, %v357_v50, 0.0 }
 0x2d0   : > { %360 = vadd.xlane.f32.xlu0 %v359_v51 }
 0x2d1   : > { %724 = shalt.err (!%p721_p7)
}
 0x2d2   : > { %s725_s5 = scalar_lea.hbm %s950_s20, 128  ;;  %s729_s10 = scalar_lea.hbm %s1023_s3, 256 }
 0x2d3   : > { %p726_p8 = scmp.ne.s32.totalorder %s950_s20, %s725_s5  ;;  %p730_p1 = scmp.lt.u32.totalorder %s950_s20, %s1023_s3 }
 0x2d4   : > { %p731_p0 = scmp.lt.u32.totalorder %s729_s10, %s725_s5  ;;  %p733_p6 = scmp.lt.u32.totalorder %s725_s5, %s950_s20 }
 0x2d5   : > { %p727_p11 = pnand %p726_p8, %p1035_p9 }
 0x2d6   : > { %p732_p5 = por %p731_p0, %p730_p1 }
 0x2d7   : > { %p728_p13 = pneg %p727_p11 }
 0x2d8   : > { %p734_p10 = por %p733_p6, %p732_p5 }
 0x2da   : > { %p735_p12 = pnand %p734_p10, %p728_p13 }
 0x2dc   : > { %738 = shalt.err (!%p735_p12)
}
 0x2dd   : > { %619 = dma.vmem_to_hbm [thread:$0]  (%p1035_p9), %s391_s22, 128, %s950_s20, %s372_s23  }
 0x2de   : > { %s227_s14 = scalar_lea.vmem [#allocation6], %s524_s9  ;;  %s979_s23 = scalar_lea.hbm %s1024_s4, %s533_s12 }
 0x2df   : > { %s403_s28 = sshll.u32 %s227_s14, 4  ;;  %s377_s30 = scalar_lea.sflag [#allocation7], %s938_s8  ;;  %s972_s28 = int_to_ptr.vmem [resolvable:$true] %s403_s28 }
 0x2e0   : > { %s739_s27 = scalar_lea.vmem %s972_s28, 128  ;;  %s820_s9 = smov [#allocation6]  }
 0x2e1   : > { %p740_p2 = scmp.ne.s32.totalorder %s972_s28, %s739_s27  ;;  %s743_s5 = sshll.u32 %s820_s9, 4  ;;  %s744_s5 = int_to_ptr.vmem [resolvable:$false] %s743_s5 }
 0x2e2   : > { %s745_s6 = scalar_lea.vmem %s744_s5, 256  ;;  %p746_p7 = scmp.lt.s32.totalorder %s972_s28, %s744_s5 }
 0x2e3   : > { %p741_p3 = pnand %p740_p2, %p1035_p9  ;;  %p747_p8 = scmp.lt.s32.totalorder %s745_s6, %s739_s27 }
 0x2e5   : > { %p742_p4 = pneg %p741_p3  ;;  %p748_p11 = por %p747_p8, %p746_p7 }
 0x2e7   : > { %p749_p13 = pnand %p748_p11, %p742_p4 }
 0x35d   : > { %v361_v52 = vpop.xlane.xlu0 %360 }
 0x35e   : > { %v362_v53 = vrot.slane %v361_v52, 4 }
 0x360   : > { %v363_v54 = vadd.f32 %v362_v53, %v361_v52 }
 0x362   : > { %v364_v55 = vrot.slane %v363_v54, 2 }
 0x364   : > { %v365_v56 = vadd.f32 %v364_v55, %v363_v54 }
 0x366   : > { %v366_v57 = vrot.slane %v365_v56, 1 }
 0x368   : > { %v367_v58 = vadd.f32 %v366_v57, %v365_v56 }
 0x36a   : > { %613 = vpush %v367_v58 }
 0x39b   : > { %s614_s29 = spop %613 }
 0x39c   : > { %v369_v59 = vstv %s614_s29 }
 0x39d   : > { %370 = vst [vmem:[%s227_s14] sm:$0xff] %v369_v59 }
 0x39e   : > { %752 = shalt.err (!%p749_p13)
}
 0x39f   : > { %s753_s19 = scalar_lea.hbm %s979_s23, 128  ;;  %s757_s7 = scalar_lea.hbm %s1024_s4, 256 }
 0x3a0   : > { %p754_p1 = scmp.ne.s32.totalorder %s979_s23, %s753_s19  ;;  %p758_p6 = scmp.lt.u32.totalorder %s979_s23, %s1024_s4 }
 0x3a1   : > { %p759_p10 = scmp.lt.u32.totalorder %s757_s7, %s753_s19  ;;  %p761_p2 = scmp.lt.u32.totalorder %s753_s19, %s979_s23 }
 0x3a2   : > { %p755_p0 = pnand %p754_p1, %p1035_p9 }
 0x3a3   : > { %p760_p12 = por %p759_p10, %p758_p6 }
 0x3a4   : > { %p756_p5 = pneg %p755_p0 }
 0x3a5   : > { %p762_p3 = por %p761_p2, %p760_p12 }
 0x3a7   : > { %p763_p4 = pnand %p762_p3, %p756_p5 }
 0x3a9   : > { %766 = shalt.err (!%p763_p4)
}
 0x3aa   : > { %620 = dma.vmem_to_hbm [thread:$0]  (%p1035_p9), %s972_s28, 128, %s979_s23, %s377_s30  }
 0x3ab PF: > { %p636_p7 = scmp.ge.s32.totalorder %s809_s18, 2  ;;  %s415_s13 = sand.u32 1, %s797_s15  }
 0x3ac   : > { %p1036_p8 = scmp.ne.s32.totalorder %s1029_s26, 0  ;;  %s416_s14 = scalar_lea.sflag [#allocation4], %s415_s13 }
 0x3ae   : > { %p628_p11 = pnand %p636_p7, %p1036_p8 }
 0x3b0   : > { %788 = dma.done.wait (!%p628_p11), %s416_s14, 128  }
 0x3b1   : > { %790 = vsyncadd (!%p628_p11), %s416_s14, 4294967168  ;;  %s425_s29 = scalar_lea.sflag [#allocation7], %s415_s13 }
 0x3b2   : > { %792 = dma.done.wait (!%p628_p11), %s425_s29, 128  }
 0x3b3   : > { %794 = vsyncadd (!%p628_p11), %s425_s29, 4294967168  ;;  %p19_p9 = scmp.ge.s32.totalorder %s871_s21, 4   ;;  %s1037_s15 = smov %s801_s16 }
 0x3b4   : > { %s1038_s16 = smov %s805_s17  ;;  %s1039_s17 = smov %s882_s24 }
 0x3b5   : > { %s1040_s18 = smov %s871_s21  ;;  %21 = sbr.rel (!%p19_p9) target bundleno = 6 (0x6), region = 92 }
 0x3bc   :  { %430 = vsyncpa [#allocation3], 1 }
 0x3bd   :  { %432 = vsyncpa [#allocation3 + $0x1], 1 }
 0x3be   :  { %433 = vsyncpa [#allocation4], 1 }
 0x3bf   :  { %435 = vsyncpa [#allocation4 + $0x1], 1 }
 0x3c0   :  { %436 = vsyncpa [#allocation7], 1 }
 0x3c1   :  { %438 = vsyncpa [#allocation7 + $0x1], 1 }

</bundles_post_ra>
